<compile_context>
chip_gen: v7x
topology: tpu7x:2x2x1
jax: 0.10.0
libtpu: 0.0.40
codegen_flags: <defaults>
</compile_context>

<pallas_src>
from functools import partial

import jax
import jax.numpy as jnp
import numpy as np
from jax.experimental import pallas as pl
from jax.experimental.pallas import tpu as pltpu


# --------------------------------------------------------------------------
# Kernel 1: pooled-token channel attention -> per-channel gate (1 + sigmoid)
# --------------------------------------------------------------------------
def _gate_kernel(y_ref, ln_g_ref, ln_b_ref, wqkv_ref, mask_ref, gate_ref,
                 qkv_ref, *, b_blk, n_tok, head_dim):
    C = wqkv_ref.shape[0]
    scaler = float(head_dim) ** (-0.5)

    # --- LayerNorm (eps=1e-6, biased variance) + fused QKV for the whole
    #     batch block: one (b_blk*N, C) x (C, 3C) MXU matmul ---
    y = y_ref[...].reshape(b_blk * n_tok, C)
    mu = jnp.mean(y, axis=-1, keepdims=True)
    var = jnp.mean(jnp.square(y - mu), axis=-1, keepdims=True)
    yn = (y - mu) * jax.lax.rsqrt(var + 1e-6)
    yn = yn * ln_g_ref[...] + ln_b_ref[...]
    qkv = jnp.dot(yn, wqkv_ref[...], preferred_element_type=jnp.float32)
    qkv_ref[...] = qkv.reshape(b_blk, n_tok, 3 * C)

    mask = mask_ref[...]                     # additive block-diagonal head mask

    def per_batch(b, carry):
        qkv_b = qkv_ref[b]                   # (N, 3C) — dynamic ref index
        q = qkv_b[:, :C] * scaler            # scaler folded into q (N,C)
        k = qkv_b[:, C:2 * C]
        v = qkv_b[:, 2 * C:]

        # S[d, e] = sum_n q[n, d] * k[n, e]  (== q_r @ k_r^T per head)
        s = jax.lax.dot_general(q, k, (((0,), (0,)), ((), ())),
                                preferred_element_type=jnp.float32) + mask
        # masked softmax over the last axis == exact per-head softmax
        s = s - jnp.max(s, axis=-1, keepdims=True)
        p = jnp.exp(s)
        attn = p * pl.reciprocal(jnp.sum(p, axis=-1, keepdims=True),
                                 approx=False)              # attn_drop = 0.0

        # O[d, n] = sum_e attn[d, e] * v[n, e]  (== attn @ v_r per head)
        o = jax.lax.dot_general(attn, v, (((1,), (1,)), ((), ())),
                                preferred_element_type=jnp.float32)  # (C, N)

        # emit 1 + sigmoid so the apply kernel is a single multiply
        g = 1.0 + jax.nn.sigmoid(jnp.mean(o, axis=-1, keepdims=True))  # (C, 1)
        gate_ref[b] = g.astype(gate_ref.dtype)
        return carry

    jax.lax.fori_loop(0, b_blk, per_batch, 0, unroll=True)


# --------------------------------------------------------------------------
# Kernel 2: lane-dense residual apply  out = gate * x   (gate = 1 + sigmoid)
# --------------------------------------------------------------------------
def _apply_gate_kernel(gate_ref, x_ref, o_ref):
    g = gate_ref[0]                                 # (C, 1) f32, has the +1
    x = x_ref[0]                                    # (C, hw_tile)
    o_ref[0] = (x * g).astype(o_ref.dtype)


# --------------------------------------------------------------------------
# Tiling heuristics
# --------------------------------------------------------------------------
def _pick_b_blk(b, n, c, budget_bytes=8 << 20):
    """Largest divisor of B whose double-buffered (b_blk,N,C) input block plus
    the qkv scratch fits the budget, targeting >= 512 MXU rows per step."""
    target_rows = 512
    best = 1
    for cand in range(1, b + 1):
        if b % cand:
            continue
        footprint = cand * n * c * 4 * 2 + cand * n * 3 * c * 4
        if footprint > budget_bytes:
            break
        best = cand
        if cand * n >= target_rows:
            break
    return best


def _pick_hw_tile(hw, c, itemsize, budget_bytes=12 << 20):
    """Lane-dense HW tile.  Returns (tile, padded_hw).

    Prefers the largest multiple-of-128 divisor of HW whose double-buffered
    (in + out) blocks fit the budget (v7x-safe).  For awkward HW, either take
    the full (small) extent or pad to a multiple of a fixed 128-aligned tile
    instead of ever putting a full huge (C, HW) block in VMEM."""
    cap = max(128, budget_bytes // (4 * c * itemsize))
    best = 0
    t = 128
    while t <= min(hw, cap):
        if hw % t == 0:
            best = t
        t += 128
    if best:
        return best, hw                              # exact tiling, no padding
    if hw * c * itemsize * 4 <= 2 * budget_bytes:
        return hw, hw                                # small ragged extent
    tile = max(128, min(2048, (cap // 128) * 128))
    return tile, int(pl.cdiv(hw, tile)) * tile       # pad in the wrapper


# --------------------------------------------------------------------------
# Parameter-load-time preprocessing (hoisted out of the forward path)
# --------------------------------------------------------------------------
def prepare_params(wq, wk, wv, head_num):
    """Fuse the QKV weights and build the additive block-diagonal head mask."""
    C = wq.shape[0]
    head_dim = C // head_num
    wqkv = jnp.concatenate([wq, wk, wv], axis=1)                    # (C, 3C)
    hid = jnp.arange(C, dtype=jnp.int32) // head_dim
    mask = jnp.where(hid[:, None] == hid[None, :], 0.0, -1e30)
    return wqkv, mask.astype(jnp.float32)                           # (C, C)


# --------------------------------------------------------------------------
# Forward wrapper
# --------------------------------------------------------------------------
def channel_self_attention(x, gamma, beta, wqkv, mask, *, head_num, window_size):
    B, C, H, W = x.shape
    Hp, Wp = H // window_size, W // window_size
    N = Hp * Wp
    head_dim = C // head_num
    HW = H * W

    # AvgPool2d(kernel=window_size, stride=window_size) + layout glue
    y = x.reshape(B, C, Hp, window_size, Wp, window_size).mean(axis=(3, 5))
    y = jnp.transpose(y, (0, 2, 3, 1)).reshape(B, N, C)

    # ---------------- gate kernel (batched over batch blocks) ---------------
    b_blk = _pick_b_blk(B, N, C)
    const = pl.Buffered(1)        # never re-indexed -> no double buffering
    gate = pl.pallas_call(
        partial(_gate_kernel, b_blk=b_blk, n_tok=N, head_dim=head_dim),
        out_shape=jax.ShapeDtypeStruct((B, C, 1), jnp.float32),
        grid_spec=pltpu.PrefetchScalarGridSpec(
            num_scalar_prefetch=0,
            grid=(B // b_blk,),
            in_specs=[
                pl.BlockSpec((b_blk, N, C), lambda i: (i, 0, 0)),   # pooled toks
                pl.BlockSpec((1, C), lambda i: (0, 0), pipeline_mode=const),
                pl.BlockSpec((1, C), lambda i: (0, 0), pipeline_mode=const),
                pl.BlockSpec((C, 3 * C), lambda i: (0, 0), pipeline_mode=const),
                pl.BlockSpec((C, C), lambda i: (0, 0), pipeline_mode=const),
            ],
            out_specs=pl.BlockSpec((b_blk, C, 1), lambda i: (i, 0, 0)),
            scratch_shapes=[pltpu.VMEM((b_blk, N, 3 * C), jnp.float32)],
        ),
        compiler_params=pltpu.CompilerParams(
            dimension_semantics=("parallel",),
            vmem_limit_bytes=32 << 20),
    )(y, gamma, beta, wqkv, mask)

    # ---------------- lane-dense residual apply: out = gate * x -------------
    x_flat = x.reshape(B, C, HW)
    hw_tile, hw_pad = _pick_hw_tile(HW, C, jnp.dtype(x.dtype).itemsize)
    if hw_pad != HW:
        x_flat = jnp.pad(x_flat, ((0, 0), (0, 0), (0, hw_pad - HW)))
    num_tiles = hw_pad // hw_tile

    out_flat = pl.pallas_call(
        _apply_gate_kernel,
        out_shape=jax.ShapeDtypeStruct((B, C, hw_pad), x.dtype),
        grid_spec=pltpu.PrefetchScalarGridSpec(
            num_scalar_prefetch=0,
            grid=(B, num_tiles),
            in_specs=[
                pl.BlockSpec((1, C, 1), lambda b, t: (b, 0, 0)),         # gate
                pl.BlockSpec((1, C, hw_tile), lambda b, t: (b, 0, t)),   # x
            ],
            out_specs=pl.BlockSpec((1, C, hw_tile), lambda b, t: (b, 0, t)),
        ),
        compiler_params=pltpu.CompilerParams(
            dimension_semantics=("parallel", "parallel"),
            vmem_limit_bytes=32 << 20),
    )(gate, x_flat)

    if hw_pad != HW:
        out_flat = out_flat[:, :, :HW]
    return out_flat.reshape(B, C, H, W)


# --------------------------------------------------------------------------
# Pure-JAX reference (mirrors the PyTorch forward) for validation
# --------------------------------------------------------------------------
def reference(x, gamma, beta, wq, wk, wv, *, head_num, window_size):
    B, C, H, W = x.shape
    Hp, Wp = H // window_size, W // window_size
    N = Hp * Wp
    hd = C // head_num

    y = x.reshape(B, C, Hp, window_size, Wp, window_size).mean(axis=(3, 5))
    y = jnp.transpose(y, (0, 2, 3, 1))                     # (B, Hp, Wp, C)
    mu = y.mean(-1, keepdims=True)
    var = ((y - mu) ** 2).mean(-1, keepdims=True)
    yn = (y - mu) / jnp.sqrt(var + 1e-6) * gamma[0] + beta[0]
    q, k, v = yn @ wq, yn @ wk, yn @ wv                    # (B, Hp, Wp, C)

    def rearr(t):
        return jnp.transpose(t, (0, 3, 1, 2)).reshape(B, head_num, hd, N)

    qr, kr, vr = rearr(q), rearr(k), rearr(v)
    attn = jnp.einsum('bhdn,bhen->bhde', qr, kr) * (hd ** -0.5)
    attn = jax.nn.softmax(attn, axis=-1)
    o = jnp.einsum('bhde,bhen->bhdn', attn, vr)            # (B, head, hd, N)
    o = o.reshape(B, C, Hp, Wp)
    gate = jax.nn.sigmoid(o.mean(axis=(2, 3), keepdims=True))
    return gate * x + x


if __name__ == "__main__":
    B, C, H, W = 2, 32, 16, 16
    head_num = 4
    window_size = 4

    key = jax.random.PRNGKey(0)
    kx, kq, kk, kv = jax.random.split(key, 4)
    x = jax.random.normal(kx, (B, C, H, W), jnp.float32)

    # Linear weights are stored as the transpose of the PyTorch layout so the
    # kernel computes y @ W directly (qkv_bias=False in the module default).
    scale = 1.0 / np.sqrt(C)
    wq = jax.random.normal(kq, (C, C), jnp.float32) * scale
    wk = jax.random.normal(kk, (C, C), jnp.float32) * scale
    wv = jax.random.normal(kv, (C, C), jnp.float32) * scale
    gamma = jnp.ones((1, C), jnp.float32)   # LayerNorm default init
    beta = jnp.zeros((1, C), jnp.float32)

    # hoisted "parameter load"-time fusion: fused Wqkv + additive head mask
    wqkv, head_mask = prepare_params(wq, wk, wv, head_num)

    out = channel_self_attention(x, gamma, beta, wqkv, head_mask,
                                 head_num=head_num, window_size=window_size)
    out = jax.block_until_ready(out)

    ref = reference(x, gamma, beta, wq, wk, wv,
                    head_num=head_num, window_size=window_size)
    np.testing.assert_allclose(np.asarray(out), np.asarray(ref),
                               rtol=1e-5, atol=1e-5)
    print("KERNEL_OK")
</pallas_src>

<mosaic_0001>
module attributes {stable_mosaic.version = 11 : i64} {
  func.func @_gate_kernel(%arg0: i32, %arg1: memref<2x16x32xf32, #tpu.memory_space<vmem>>, %arg2: memref<1x32xf32, #tpu.memory_space<vmem>>, %arg3: memref<1x32xf32, #tpu.memory_space<vmem>>, %arg4: memref<32x96xf32, #tpu.memory_space<vmem>>, %arg5: memref<32x32xf32, #tpu.memory_space<vmem>>, %arg6: memref<2x32x1xf32, #tpu.memory_space<vmem>>, %arg7: memref<2x16x96xf32, #tpu.memory_space<vmem>>) attributes {dimension_semantics = [#tpu.dimension_semantics<parallel>], iteration_bounds = array<i64: 1>, scalar_prefetch = 0 : i64, scratch_operands = 1 : i64, tpu.core_type = #tpu.core_type<tc>, window_params = [{transform_indices = @transform_0, window_bounds = array<i64: 2, 16, 32>}, {pipeline_mode = #tpu.pipeline_mode<synchronous>, transform_indices = @transform_1, window_bounds = array<i64: 1, 32>}, {pipeline_mode = #tpu.pipeline_mode<synchronous>, transform_indices = @transform_2, window_bounds = array<i64: 1, 32>}, {pipeline_mode = #tpu.pipeline_mode<synchronous>, transform_indices = @transform_3, window_bounds = array<i64: 32, 96>}, {pipeline_mode = #tpu.pipeline_mode<synchronous>, transform_indices = @transform_4, window_bounds = array<i64: 32, 32>}, {transform_indices = @transform_5, window_bounds = array<i64: 2, 32, 1>}]} {
    %c0 = arith.constant 0 : index
    %c0_0 = arith.constant 0 : index
    %c0_1 = arith.constant 0 : index
    %0 = vector.load %arg1[%c0, %c0_0, %c0_1] : memref<2x16x32xf32, #tpu.memory_space<vmem>>, vector<2x16x32xf32>
    %1 = vector.shape_cast %0 : vector<2x16x32xf32> to vector<32x32xf32>
    %cst = arith.constant dense<0.000000e+00> : vector<32xf32>
    %2 = vector.multi_reduction <add>, %1, %cst [1] : vector<32x32xf32> to vector<32xf32>
    %3 = vector.shape_cast %2 : vector<32xf32> to vector<32x1xf32>
    %cst_2 = arith.constant 3.200000e+01 : f32
    %4 = vector.broadcast %cst_2 : f32 to vector<32x1xf32>
    %5 = arith.divf %3, %4 : vector<32x1xf32>
    %6 = vector.broadcast %5 : vector<32x1xf32> to vector<32x32xf32>
    %7 = arith.subf %1, %6 : vector<32x32xf32>
    %8 = arith.mulf %7, %7 : vector<32x32xf32>
    %cst_3 = arith.constant dense<0.000000e+00> : vector<32xf32>
    %9 = vector.multi_reduction <add>, %8, %cst_3 [1] : vector<32x32xf32> to vector<32xf32>
    %10 = vector.shape_cast %9 : vector<32xf32> to vector<32x1xf32>
    %cst_4 = arith.constant 3.200000e+01 : f32
    %11 = vector.broadcast %cst_4 : f32 to vector<32x1xf32>
    %12 = arith.divf %10, %11 : vector<32x1xf32>
    %13 = vector.broadcast %5 : vector<32x1xf32> to vector<32x32xf32>
    %14 = arith.subf %1, %13 : vector<32x32xf32>
    %cst_5 = arith.constant 9.99999997E-7 : f32
    %15 = vector.broadcast %cst_5 : f32 to vector<32x1xf32>
    %16 = arith.addf %12, %15 : vector<32x1xf32>
    %17 = math.rsqrt %16 : vector<32x1xf32>
    %18 = vector.broadcast %17 : vector<32x1xf32> to vector<32x32xf32>
    %19 = arith.mulf %14, %18 : vector<32x32xf32>
    %c0_6 = arith.constant 0 : index
    %c0_7 = arith.constant 0 : index
    %20 = vector.load %arg2[%c0_6, %c0_7] : memref<1x32xf32, #tpu.memory_space<vmem>>, vector<1x32xf32>
    %21 = vector.broadcast %20 : vector<1x32xf32> to vector<32x32xf32>
    %22 = arith.mulf %19, %21 : vector<32x32xf32>
    %c0_8 = arith.constant 0 : index
    %c0_9 = arith.constant 0 : index
    %23 = vector.load %arg3[%c0_8, %c0_9] : memref<1x32xf32, #tpu.memory_space<vmem>>, vector<1x32xf32>
    %24 = vector.broadcast %23 : vector<1x32xf32> to vector<32x32xf32>
    %25 = arith.addf %22, %24 : vector<32x32xf32>
    %c0_10 = arith.constant 0 : index
    %c0_11 = arith.constant 0 : index
    %26 = vector.load %arg4[%c0_10, %c0_11] : memref<32x96xf32, #tpu.memory_space<vmem>>, vector<32x96xf32>
    %cst_12 = arith.constant dense<0.000000e+00> : vector<32x96xf32>
    %27 = tpu.matmul %25, %26, %cst_12 {dimension_numbers = #tpu.dot_dimension_numbers<[1], [0], [0], [1], [0, 0, 1, 1], [], []>} : vector<32x32xf32>, vector<32x96xf32>, vector<32x96xf32> -> vector<32x96xf32>
    %28 = vector.shape_cast %27 : vector<32x96xf32> to vector<2x16x96xf32>
    %c0_13 = arith.constant 0 : index
    %c0_14 = arith.constant 0 : index
    %c0_15 = arith.constant 0 : index
    %29 = vector.load %arg7[%c0_13, %c0_14, %c0_15] : memref<2x16x96xf32, #tpu.memory_space<vmem>>, vector<2x16x96xf32>
    tpu.vector_store %arg7[%c0_13, %c0_14, %c0_15], %28 {strides = array<i32>} : memref<2x16x96xf32, #tpu.memory_space<vmem>>, vector<2x16x96xf32>,
    %c0_16 = arith.constant 0 : index
    %c0_17 = arith.constant 0 : index
    %30 = vector.load %arg5[%c0_16, %c0_17] : memref<32x32xf32, #tpu.memory_space<vmem>>, vector<32x32xf32>
    %c0_i32 = arith.constant 0 : i32
    %31 = arith.index_cast %c0_i32 : i32 to index
    %c0_18 = arith.constant 0 : index
    %c0_19 = arith.constant 0 : index
    %32 = vector.load %arg7[%31, %c0_18, %c0_19] : memref<2x16x96xf32, #tpu.memory_space<vmem>>, vector<1x16x96xf32>
    %33 = vector.shape_cast %32 : vector<1x16x96xf32> to vector<16x96xf32>
    %34 = vector.extract_strided_slice %33 {offsets = [0, 0], sizes = [16, 32], strides = [1, 1]} : vector<16x96xf32> to vector<16x32xf32>
    %cst_20 = arith.constant 0.353553385 : f32
    %35 = vector.broadcast %cst_20 : f32 to vector<16x32xf32>
    %36 = arith.mulf %34, %35 : vector<16x32xf32>
    %37 = vector.extract_strided_slice %33 {offsets = [0, 32], sizes = [16, 32], strides = [1, 1]} : vector<16x96xf32> to vector<16x32xf32>
    %38 = vector.extract_strided_slice %33 {offsets = [0, 64], sizes = [16, 32], strides = [1, 1]} : vector<16x96xf32> to vector<16x32xf32>
    %cst_21 = arith.constant dense<0.000000e+00> : vector<32x32xf32>
    %39 = tpu.matmul %36, %37, %cst_21 {dimension_numbers = #tpu.dot_dimension_numbers<[0], [0], [1], [1], [0, 1, 1, 1], [], []>} : vector<16x32xf32>, vector<16x32xf32>, vector<32x32xf32> -> vector<32x32xf32>
    %40 = arith.addf %39, %30 : vector<32x32xf32>
    %cst_22 = arith.constant dense<0xFF800000> : vector<32xf32>
    %41 = vector.multi_reduction <maximumf>, %40, %cst_22 [1] : vector<32x32xf32> to vector<32xf32>
    %42 = vector.shape_cast %41 : vector<32xf32> to vector<32x1xf32>
    %43 = vector.broadcast %42 : vector<32x1xf32> to vector<32x32xf32>
    %44 = arith.subf %40, %43 : vector<32x32xf32>
    %45 = math.exp %44 : vector<32x32xf32>
    %cst_23 = arith.constant dense<0.000000e+00> : vector<32xf32>
    %46 = vector.multi_reduction <add>, %45, %cst_23 [1] : vector<32x32xf32> to vector<32xf32>
    %47 = vector.shape_cast %46 : vector<32xf32> to vector<32x1xf32>
    %48 = tpu.reciprocal %47 : vector<32x1xf32> -> vector<32x1xf32>
    %49 = vector.broadcast %48 : vector<32x1xf32> to vector<32x32xf32>
    %50 = arith.mulf %45, %49 : vector<32x32xf32>
    %cst_24 = arith.constant dense<0.000000e+00> : vector<32x16xf32>
    %51 = tpu.matmul %50, %38, %cst_24 {dimension_numbers = #tpu.dot_dimension_numbers<[1], [1], [0], [0], [0, 0, 1, 0], [], []>} : vector<32x32xf32>, vector<16x32xf32>, vector<32x16xf32> -> vector<32x16xf32>
    %cst_25 = arith.constant dense<0.000000e+00> : vector<32xf32>
    %52 = vector.multi_reduction <add>, %51, %cst_25 [1] : vector<32x16xf32> to vector<32xf32>
    %53 = vector.shape_cast %52 : vector<32xf32> to vector<32x1xf32>
    %cst_26 = arith.constant 1.600000e+01 : f32
    %54 = vector.broadcast %cst_26 : f32 to vector<32x1xf32>
    %55 = arith.divf %53, %54 : vector<32x1xf32>
    %56 = arith.negf %55 : vector<32x1xf32>
    %57 = math.exp %56 : vector<32x1xf32>
    %cst_27 = arith.constant 1.000000e+00 : f32
    %58 = vector.broadcast %cst_27 : f32 to vector<32x1xf32>
    %59 = arith.addf %58, %57 : vector<32x1xf32>
    %60 = arith.divf %58, %59 : vector<32x1xf32>
    %cst_28 = arith.constant 1.000000e+00 : f32
    %61 = vector.broadcast %cst_28 : f32 to vector<32x1xf32>
    %62 = arith.addf %61, %60 : vector<32x1xf32>
    %63 = arith.index_cast %c0_i32 : i32 to index
    %c0_29 = arith.constant 0 : index
    %c0_30 = arith.constant 0 : index
    %64 = vector.load %arg6[%63, %c0_29, %c0_30] : memref<2x32x1xf32, #tpu.memory_space<vmem>>, vector<1x32x1xf32>
    %65 = vector.shape_cast %64 : vector<1x32x1xf32> to vector<32x1xf32>
    %66 = vector.shape_cast %62 : vector<32x1xf32> to vector<1x32x1xf32>
    tpu.vector_store %arg6[%63, %c0_29, %c0_30], %66 {strides = array<i32>} : memref<2x32x1xf32, #tpu.memory_space<vmem>>, vector<1x32x1xf32>,
    %c1_i32 = arith.constant 1 : i32
    %67 = arith.index_cast %c1_i32 : i32 to index
    %c0_31 = arith.constant 0 : index
    %c0_32 = arith.constant 0 : index
    %68 = vector.load %arg7[%67, %c0_31, %c0_32] : memref<2x16x96xf32, #tpu.memory_space<vmem>>, vector<1x16x96xf32>
    %69 = vector.shape_cast %68 : vector<1x16x96xf32> to vector<16x96xf32>
    %70 = vector.extract_strided_slice %69 {offsets = [0, 0], sizes = [16, 32], strides = [1, 1]} : vector<16x96xf32> to vector<16x32xf32>
    %cst_33 = arith.constant 0.353553385 : f32
    %71 = vector.broadcast %cst_33 : f32 to vector<16x32xf32>
    %72 = arith.mulf %70, %71 : vector<16x32xf32>
    %73 = vector.extract_strided_slice %69 {offsets = [0, 32], sizes = [16, 32], strides = [1, 1]} : vector<16x96xf32> to vector<16x32xf32>
    %74 = vector.extract_strided_slice %69 {offsets = [0, 64], sizes = [16, 32], strides = [1, 1]} : vector<16x96xf32> to vector<16x32xf32>
    %cst_34 = arith.constant dense<0.000000e+00> : vector<32x32xf32>
    %75 = tpu.matmul %72, %73, %cst_34 {dimension_numbers = #tpu.dot_dimension_numbers<[0], [0], [1], [1], [0, 1, 1, 1], [], []>} : vector<16x32xf32>, vector<16x32xf32>, vector<32x32xf32> -> vector<32x32xf32>
    %76 = arith.addf %75, %30 : vector<32x32xf32>
    %cst_35 = arith.constant dense<0xFF800000> : vector<32xf32>
    %77 = vector.multi_reduction <maximumf>, %76, %cst_35 [1] : vector<32x32xf32> to vector<32xf32>
    %78 = vector.shape_cast %77 : vector<32xf32> to vector<32x1xf32>
    %79 = vector.broadcast %78 : vector<32x1xf32> to vector<32x32xf32>
    %80 = arith.subf %76, %79 : vector<32x32xf32>
    %81 = math.exp %80 : vector<32x32xf32>
    %cst_36 = arith.constant dense<0.000000e+00> : vector<32xf32>
    %82 = vector.multi_reduction <add>, %81, %cst_36 [1] : vector<32x32xf32> to vector<32xf32>
    %83 = vector.shape_cast %82 : vector<32xf32> to vector<32x1xf32>
    %84 = tpu.reciprocal %83 : vector<32x1xf32> -> vector<32x1xf32>
    %85 = vector.broadcast %84 : vector<32x1xf32> to vector<32x32xf32>
    %86 = arith.mulf %81, %85 : vector<32x32xf32>
    %cst_37 = arith.constant dense<0.000000e+00> : vector<32x16xf32>
    %87 = tpu.matmul %86, %74, %cst_37 {dimension_numbers = #tpu.dot_dimension_numbers<[1], [1], [0], [0], [0, 0, 1, 0], [], []>} : vector<32x32xf32>, vector<16x32xf32>, vector<32x16xf32> -> vector<32x16xf32>
    %cst_38 = arith.constant dense<0.000000e+00> : vector<32xf32>
    %88 = vector.multi_reduction <add>, %87, %cst_38 [1] : vector<32x16xf32> to vector<32xf32>
    %89 = vector.shape_cast %88 : vector<32xf32> to vector<32x1xf32>
    %cst_39 = arith.constant 1.600000e+01 : f32
    %90 = vector.broadcast %cst_39 : f32 to vector<32x1xf32>
    %91 = arith.divf %89, %90 : vector<32x1xf32>
    %92 = arith.negf %91 : vector<32x1xf32>
    %93 = math.exp %92 : vector<32x1xf32>
    %cst_40 = arith.constant 1.000000e+00 : f32
    %94 = vector.broadcast %cst_40 : f32 to vector<32x1xf32>
    %95 = arith.addf %94, %93 : vector<32x1xf32>
    %96 = arith.divf %94, %95 : vector<32x1xf32>
    %cst_41 = arith.constant 1.000000e+00 : f32
    %97 = vector.broadcast %cst_41 : f32 to vector<32x1xf32>
    %98 = arith.addf %97, %96 : vector<32x1xf32>
    %99 = arith.index_cast %c1_i32 : i32 to index
    %c0_42 = arith.constant 0 : index
    %c0_43 = arith.constant 0 : index
    %100 = vector.load %arg6[%99, %c0_42, %c0_43] : memref<2x32x1xf32, #tpu.memory_space<vmem>>, vector<1x32x1xf32>
    %101 = vector.shape_cast %100 : vector<1x32x1xf32> to vector<32x1xf32>
    %102 = vector.shape_cast %98 : vector<32x1xf32> to vector<1x32x1xf32>
    tpu.vector_store %arg6[%99, %c0_42, %c0_43], %102 {strides = array<i32>} : memref<2x32x1xf32, #tpu.memory_space<vmem>>, vector<1x32x1xf32>,
    %c2_i32 = arith.constant 2 : i32
    return
  }
  func.func @transform_0(%arg0: i32) -> (i32, i32, i32) {
    %c0_i32 = arith.constant 0 : i32
    %c0_i32_0 = arith.constant 0 : i32
    %c0_i32_1 = arith.constant 0 : i32
    return %arg0, %c0_i32, %c0_i32_0 : i32, i32, i32
  }
  func.func @transform_1(%arg0: i32) -> (i32, i32) {
    %c0_i32 = arith.constant 0 : i32
    %c0_i32_0 = arith.constant 0 : i32
    %c0_i32_1 = arith.constant 0 : i32
    return %c0_i32, %c0_i32_0 : i32, i32
  }
  func.func @transform_2(%arg0: i32) -> (i32, i32) {
    %c0_i32 = arith.constant 0 : i32
    %c0_i32_0 = arith.constant 0 : i32
    %c0_i32_1 = arith.constant 0 : i32
    return %c0_i32, %c0_i32_0 : i32, i32
  }
  func.func @transform_3(%arg0: i32) -> (i32, i32) {
    %c0_i32 = arith.constant 0 : i32
    %c0_i32_0 = arith.constant 0 : i32
    %c0_i32_1 = arith.constant 0 : i32
    return %c0_i32, %c0_i32_0 : i32, i32
  }
  func.func @transform_4(%arg0: i32) -> (i32, i32) {
    %c0_i32 = arith.constant 0 : i32
    %c0_i32_0 = arith.constant 0 : i32
    %c0_i32_1 = arith.constant 0 : i32
    return %c0_i32, %c0_i32_0 : i32, i32
  }
  func.func @transform_5(%arg0: i32) -> (i32, i32, i32) {
    %c0_i32 = arith.constant 0 : i32
    %c0_i32_0 = arith.constant 0 : i32
    %c0_i32_1 = arith.constant 0 : i32
    return %arg0, %c0_i32, %c0_i32_0 : i32, i32, i32
  }
}

</mosaic_0001>

<bundles_post_ra>
// kernel: tpu_custom_call.1
= control target key start
LH: loop header
LB: loop body
LE: loop exit
PB: predicated region body
PF: predicated region fallthrough
CT: control target
= control target key end

     0   :  { %10 = vsyncpa [#allocation4], 0  ;;  %s1465_s0 = inlined_call_operand.hbm [shape: f32[2,16,32], index: 0, kind: input, shape index: {}]   ;;  %s1466_s1 = inlined_call_operand.vmem [shape: f32[1,32], index: 1, kind: input, shape index: {}]   ;;  %s1467_s2 = inlined_call_operand.vmem [shape: f32[1,32], index: 2, kind: input, shape index: {}]   ;;  %s1468_s3 = inlined_call_operand.hbm [shape: f32[32,96], index: 3, kind: input, shape index: {}]   ;;  %s1469_s4 = inlined_call_operand.hbm [shape: f32[32,32], index: 4, kind: input, shape index: {}]   ;;  %s1470_s5 = inlined_call_operand.vmem [shape: f32[2,32,1], index: 5, kind: output, shape index: {}]  }
   0x1   :  { %11 = vsyncpa [#allocation6], 0  ;;  %s1260_s18 = smov [#allocation5]   ;;  %s1261_s20 = smov [#allocation3]  }
   0x2   :  { %s33_s19 = sshll.u32 %s1260_s18, 4  ;;  %s17_s21 = sshll.u32 %s1261_s20, 4  ;;  %s34_s19 = int_to_ptr.vmem [resolvable:$true] %s33_s19  ;;  %s1297_s21 = int_to_ptr.vmem [resolvable:$true] %s17_s21 }
   0x3   :  { %s1190_s24 = scalar_lea.hbm %s1468_s3, 512 }
   0x4   :  { %p1191_p0 = scmp.ne.s32.totalorder %s1468_s3, %s1190_s24  ;;  %p1194_p1 = scmp.lt.u32.totalorder %s1190_s24, %s1468_s3 }
   0x6   :  { %p1196_p2 = pnand %p1194_p1, %p1191_p0 }
   0x8   :  { %1199 = shalt.err (!%p1196_p2)
}
   0x9   :  { %s1200_s29 = scalar_lea.vmem %s34_s19, 512  ;;  %p1205_p4 = scmp.lt.s32.totalorder %s34_s19, %s34_s19 }
   0xa   :  { %p1201_p3 = scmp.ne.s32.totalorder %s34_s19, %s1200_s29  ;;  %p1206_p5 = scmp.lt.s32.totalorder %s1200_s29, %s1200_s29 }
   0xc   :  { %p1207_p6 = por %p1206_p5, %p1205_p4 }
   0xe   :  { %p1208_p7 = pnand %p1207_p6, %p1201_p3 }
  0x10   :  { %1211 = shalt.err (!%p1208_p7)
}
  0x11   :  { %s1262_s30 = smov 128   ;;  %s1263_s6 = smov 8  }
  0x12   :  { %39 = dma.hbm_to_vmem [thread:$0]  %s1468_s3, 512, %s34_s19, [#allocation6], %s1262_s30, %s1262_s30, %s1263_s6  }
  0x13   :  { %s1212_s11 = scalar_lea.hbm %s1465_s0, 512 }
  0x14   :  { %p1213_p8 = scmp.ne.s32.totalorder %s1465_s0, %s1212_s11  ;;  %p1216_p9 = scmp.lt.u32.totalorder %s1212_s11, %s1465_s0 }
  0x16   :  { %p1218_p10 = pnand %p1216_p9, %p1213_p8 }
  0x18   :  { %1221 = shalt.err (!%p1218_p10)
}
  0x19   :  { %s1222_s16 = scalar_lea.vmem %s1297_s21, 512  ;;  %p1227_p12 = scmp.lt.s32.totalorder %s1297_s21, %s1297_s21 }
  0x1a   :  { %p1223_p11 = scmp.ne.s32.totalorder %s1297_s21, %s1222_s16  ;;  %p1228_p13 = scmp.lt.s32.totalorder %s1222_s16, %s1222_s16 }
  0x1c   :  { %p1229_p0 = por %p1228_p13, %p1227_p12 }
  0x1e   :  { %p1230_p1 = pnand %p1229_p0, %p1223_p11 }
  0x20   :  { %1233 = shalt.err (!%p1230_p1)
}
  0x21   :  { %23 = dma.hbm_to_vmem [thread:$0]  %s1465_s0, 512, %s1297_s21, [#allocation4], %s1262_s30, %s1262_s30, %s1263_s6  }
  0x22   :  { %s1264_s18 = smov [#allocation7]   ;;  %s1234_s23 = scalar_lea.hbm %s1469_s4, 512 }
  0x23   :  { %s45_s19 = sshll.u32 %s1264_s18, 4  ;;  %p1235_p2 = scmp.ne.s32.totalorder %s1469_s4, %s1234_s23  ;;  %s46_s19 = int_to_ptr.vmem [resolvable:$true] %s45_s19 }
  0x24   :  { %p1238_p3 = scmp.lt.u32.totalorder %s1234_s23, %s1469_s4 }
  0x26   :  { %p1240_p4 = pnand %p1238_p3, %p1235_p2 }
  0x28   :  { %1243 = shalt.err (!%p1240_p4)
}
  0x29   :  { %s1244_s28 = scalar_lea.vmem %s46_s19, 512  ;;  %p1249_p6 = scmp.lt.s32.totalorder %s46_s19, %s46_s19 }
  0x2a   :  { %p1245_p5 = scmp.ne.s32.totalorder %s46_s19, %s1244_s28  ;;  %p1250_p7 = scmp.lt.s32.totalorder %s1244_s28, %s1244_s28 }
  0x2c   :  { %p1251_p8 = por %p1250_p7, %p1249_p6 }
  0x2e   :  { %p1252_p9 = pnand %p1251_p8, %p1245_p5 }
  0x30   :  { %1255 = shalt.err (!%p1252_p9)
}
  0x31   :  { %51 = dma.hbm_to_vmem [thread:$0]  %s1469_s4, 512, %s46_s19, [#allocation6], %s1262_s30, %s1262_s30, %s1263_s6  }
  0x32   :  { %1256 = dma.done.wait [#allocation4], 512  }
  0x33   :  { %1257 = vsyncadd [#allocation4], 4294966784 }
  0x34   :  { %1258 = dma.done.wait [#allocation6], 1024  }
  0x35   :  { %1259 = vsyncadd [#allocation6], 4294966272  ;;  %vm65_vm0 = vcmask 261120   ;;  %v61_v0 = vld [vmem:[#allocation3] sm:$0xff]  ;;  %v63_v1 = vld [vmem:[#allocation3 + $0x10] sm:$0xff]  ;;  %vm242_vm1 = vcmask 785408  }
  0x36   :  { %v62_v2 = vld [vmem:[#allocation3 + $0x8] sm:$0xff]  ;;  %v66_v3 = vsel %vm65_vm0, %v61_v0, 0.0  ;;  %v72_v4 = vsel %vm65_vm0, %v63_v1, 0.0  ;;  %v64_v5 = vld [vmem:[#allocation3 + $0x18] sm:$0xff]  ;;  %v141_v28 = vld [vmem:[#allocation5] sm:$0xff]  ;;  %vm295_vm2 = vcmask 130048  }
  0x37   :  { %67 = vadd.xlane.f32.xlu0 %v66_v3  ;;  %73 = vadd.xlane.f32.xlu1 %v72_v4  ;;  %v69_v6 = vsel %vm65_vm0, %v62_v2, 0.0  ;;  %v75_v7 = vsel %vm65_vm0, %v64_v5, 0.0  ;;  %v142_v29 = vld [vmem:[#allocation5 + $0x8] sm:$0xff]  ;;  %v143_v30 = vld [vmem:[#allocation5 + $0x10] sm:$0xff]  ;;  %v144_v32 = vld [vmem:[#allocation5 + $0x18] sm:$0xff]  ;;  %vm587_vm4 = vcmask 7168  }
  0x38   :  { %v1062_v31 = vpack.c.bf16 %v142_v29, %v141_v28  ;;  %v1066_v33 = vpack.c.bf16 %v144_v32, %v143_v30  ;;  %v938_v47 = vld [vmem:[%s1466_s1] ss:$0 sm:$0xff]  ;;  %s1265_s1 = smov 96   ;;  %vm1405_vm3 = vmpackc.low %vm65_vm0, %vm65_vm0 }
  0x39   :  { %v939_v49 = vld [vmem:[%s1467_s2] ss:$0 sm:$0xff]  ;;  %s1266_s2 = smov 64  }
  0x3a   :  { %1063 = vmatprep.subr.bf16.mxu0 %v1062_v31 }
  0x3b   :  { %70 = vadd.xlane.f32.xlu0 %v69_v6  ;;  %76 = vadd.xlane.f32.xlu1 %v75_v7 }
  0x3c   :  { %1065 = vmatpush3.bf16.msra.mxu0 %v1062_v31 }
  0x3d   :  { %1067 = vmatprep.subr.bf16.mxu0 %v1066_v33 }
  0x40   :  { %1069 = vmatpush3.bf16.msra.mxu0 %v1066_v33 }
  0xc4   :  { %v68_v8 = vpop.xlane.xlu0 %67  ;;  %v74_v9 = vpop.xlane.xlu1 %73 }
  0xc5   :  { %v79_v10 = vmul.f32 0.03125, %v68_v8  ;;  %v81_v11 = vmul.f32 0.03125, %v74_v9 }
  0xc7   :  { %v83_v12 = vsub.f32 %v61_v0, %v79_v10  ;;  %v85_v13 = vsub.f32 %v63_v1, %v81_v11 }
  0xc8   :  { %v71_v14 = vpop.xlane.xlu0 %70  ;;  %v77_v15 = vpop.xlane.xlu1 %76 }
  0xc9   :  { %v80_v16 = vmul.f32 0.03125, %v71_v14  ;;  %v82_v17 = vmul.f32 0.03125, %v77_v15  ;;  %v87_v18 = vmul.f32 %v83_v12, %v83_v12  ;;  %v89_v19 = vmul.f32 %v85_v13, %v85_v13 }
  0xcb   :  { %v84_v20 = vsub.f32 %v62_v2, %v80_v16  ;;  %v86_v21 = vsub.f32 %v64_v5, %v82_v17  ;;  %v91_v22 = vsel %vm65_vm0, %v87_v18, 0.0  ;;  %v97_v23 = vsel %vm65_vm0, %v89_v19, 0.0 }
  0xcc   :  { %92 = vadd.xlane.f32.xlu0 %v91_v22 }
  0xcd   :  { %v88_v24 = vmul.f32 %v84_v20, %v84_v20  ;;  %v90_v25 = vmul.f32 %v86_v21, %v86_v21 }
  0xcf   :  { %v94_v26 = vsel %vm65_vm0, %v88_v24, 0.0  ;;  %v100_v27 = vsel %vm65_vm0, %v90_v25, 0.0 }
  0xd0   :  { %98 = vadd.xlane.f32.xlu0 %v97_v23  ;;  %95 = vadd.xlane.f32.xlu1 %v94_v26 }
  0xd4   :  { %101 = vadd.xlane.f32.xlu1 %v100_v27 }
 0x159   :  { %v93_v34 = vpop.xlane.xlu0 %92 }
 0x15a   :  { %v103_v35 = vmul.f32 0.03125, %v93_v34  ;;  %v248_v34 = vld [vmem:[#allocation7 + $0x8] sm:$0xff] }
 0x15c   :  { %v107_v36 = vadd.f32 1e-06, %v103_v35  ;;  %v247_v35 = vld [vmem:[#allocation7] sm:$0xff] }
 0x15d   :  { %v96_v37 = vpop.xlane.xlu1 %95  ;;  %v99_v38 = vpop.xlane.xlu0 %98 }
 0x15e   :  { %1118 = vrsqrt.f32 %v107_v36  ;;  %v104_v39 = vmul.f32 0.03125, %v96_v37  ;;  %v105_v40 = vmul.f32 0.03125, %v99_v38 }
 0x160   :  { %v108_v41 = vadd.f32 1e-06, %v104_v39  ;;  %v109_v42 = vadd.f32 1e-06, %v105_v40 }
 0x161   :  { %v102_v43 = vpop.xlane.xlu1 %101 }
 0x162   :  { %1120 = vrsqrt.f32 %v108_v41  ;;  %v106_v44 = vmul.f32 0.03125, %v102_v43  ;;  %v249_v43 = vld [vmem:[#allocation7 + $0x10] sm:$0xff] }
 0x163   :  { %1122 = vrsqrt.f32 %v109_v42  ;;  %v250_v42 = vld [vmem:[#allocation7 + $0x18] sm:$0xff] }
 0x164   :  { %v110_v45 = vadd.f32 1e-06, %v106_v44 }
 0x166   :  { %1124 = vrsqrt.f32 %v110_v45 }
 0x168   :  { %v1119_v46 = vpop.eup %1118 }
 0x169   :  { %v115_v48 = vmul.f32 %v1119_v46, %v83_v12 }
 0x16b   :  { %v126_v50 = vmul.f32 %v938_v47, %v115_v48 }
 0x16c   :  { %v1121_v51 = vpop.eup %1120 }
 0x16d   :  { %v1123_v52 = vpop.eup %1122  ;;  %v137_v53 = vadd.f32 %v939_v49, %v126_v50  ;;  %v116_v54 = vmul.f32 %v1121_v51, %v84_v20 }
 0x16e   :  { %v117_v55 = vmul.f32 %v1123_v52, %v85_v13 }
 0x16f   :  { %1016 = vmatprep.mubr.msk.f32.mxu0 %vm65_vm0, %v137_v53  ;;  %v127_v56 = vmul.f32 %v938_v47, %v116_v54 }
 0x170   :  { %v1125_v57 = vpop.eup %1124  ;;  %v128_v58 = vmul.f32 %v938_v47, %v117_v55 }
 0x171   :  { %v138_v59 = vadd.f32 %v939_v49, %v127_v56  ;;  %v118_v60 = vmul.f32 %v1125_v57, %v86_v21 }
 0x172   :  { %v139_v61 = vadd.f32 %v939_v49, %v128_v58 }
 0x173   :  { %1017 = vmatmul.mubr.msk.f32.vlgmr.msra.gmra.mrb[0].mxu0 %vm65_vm0, %v138_v59  ;;  %v129_v62 = vmul.f32 %v938_v47, %v118_v60 }
 0x174   :  { %1019 = vmatprep.mubr.msk.f32.mxu0 %vm65_vm0, %v139_v61 }
 0x175   :  { %v140_v63 = vadd.f32 %v939_v49, %v129_v62 }
 0x177   :  { %1020 = vmatmul.mubr.msk.f32.gmra.mrb[2].mxu0 %vm65_vm0, %v140_v63 }
 0x246   :  { %v1018_v0 = vpop.f32.mrb[0].mxu0 }
 0x247   :  { %244 = vst.msk [vmem:[#allocation2 + $0x8] sm:$0xff] %vm242_vm1, %v1018_v0  ;;  %v223_v1 = vpop.f32.mrb[1].mxu0 }
 0x248   :  { %243 = vst.msk [vmem:[#allocation2] sm:$0xff] %vm242_vm1, %v223_v1 }
 0x24a   :  { %v1021_v2 = vpop.f32.mrb[2].mxu0 }
 0x24b   :  { %246 = vst.msk [vmem:[#allocation2 + $0x18] sm:$0xff] %vm242_vm1, %v1021_v2  ;;  %v233_v3 = vpop.f32.mrb[3].mxu0 }
 0x24c   :  { %245 = vst.msk [vmem:[#allocation2 + $0x10] sm:$0xff] %vm242_vm1, %v233_v3 }
 0x24e   :  { %v252_v4 = vld [vmem:[#allocation2 + $0x8] sm:$0xff] }
 0x24f   :  { %v251_v5 = vld [vmem:[#allocation2] sm:$0xff]  ;;  %v254_v13 = vmul.f32 0.35355338, %v252_v4 }
 0x250   :  { %v1367_v6 = vpack.i.bf16 %v252_v4, %v251_v5  ;;  %v253_v12 = vmul.f32 0.35355338, %v251_v5 }
 0x252   :  { %1099 = vrot.lane.b32.xlu0 %v1367_v6, %s1265_s1  ;;  %v594_v7 = vld [vmem:[#allocation2 + $0x18] sm:$0xff] }
 0x253   :  { %v593_v8 = vld [vmem:[#allocation2 + $0x10] sm:$0xff]  ;;  %v596_v11 = vmul.f32 0.35355338, %v594_v7 }
 0x254   :  { %v1370_v9 = vpack.i.bf16 %v594_v7, %v593_v8  ;;  %v595_v10 = vmul.f32 0.35355338, %v593_v8 }
 0x256   :  { %1104 = vrot.lane.b32.xlu1 %v1370_v9, %s1265_s1 }
 0x270   :  { %597 = vxpose.xlu0.b32.start [1/2] (short) (narrow) %v595_v10, 32 }
 0x274   :  { %598 = vxpose.xlu0.b32.end [2/2] (short) (narrow) %v596_v11, 32 }
 0x27f   :  { %255 = vxpose.xlu1.b32.start [1/2] (short) (narrow) %v253_v12, 32 }
 0x283   :  { %256 = vxpose.xlu1.b32.end [2/2] (short) (narrow) %v254_v13, 32 }
 0x2c4   :  { %v1100_v14 = vpop.permute.xlu0 %1099 }
 0x2c5   :  { %v1102_v15 = vunpack.i.h.bf16 %v1100_v14  ;;  %v1101_v16 = vunpack.i.l.bf16 %v1100_v14 }
 0x2c7   :  { %v1070_v17 = vpack.c.bf16 %v1102_v15, %v1101_v16 }
 0x2c8   :  { %v1105_v18 = vpop.permute.xlu1 %1104 }
 0x2c9   :  { %v1107_v19 = vunpack.i.h.bf16 %v1105_v18  ;;  %v1106_v20 = vunpack.i.l.bf16 %v1105_v18  ;;  %1071 = vmatprep.subr.bf16.mxu1 %v1070_v17 }
 0x2ca   :  { %1073 = vmatpush3.bf16.msra.mxu1 %v1070_v17 }
 0x2cb   :  { %v1080_v21 = vpack.c.bf16 %v1107_v19, %v1106_v20 }
 0x2cd   :  { %1081 = vmatprep.subr.bf16.mxu0 %v1080_v21 }
 0x2ce   :  { %1083 = vmatpush3.bf16.msra.mxu0 %v1080_v21 }
 0x2f0   :  { %v613_v22 = vpop.trf.xlu0 }
 0x2f1   :  { %1046 = vmatprep.mubr.msk.f32.mxu0 %vm295_vm2, %v613_v22 }
 0x2f4   :  { %v614_v23 = vpop.trf.xlu0 }
 0x2f5   :  { %1047 = vmatmul.mubr.msk.f32.vlgmr.msra.gmra.mrb[4].mxu0 %vm295_vm2, %v614_v23 }
 0x2f8   :  { %v615_v24 = vpop.trf.xlu0 }
 0x2f9   :  { %1049 = vmatprep.mubr.msk.f32.mxu0 %vm295_vm2, %v615_v24 }
 0x2fc   :  { %v616_v25 = vpop.trf.xlu0 }
 0x2fd   :  { %1050 = vmatmul.mubr.msk.f32.gmra.mrb[6].mxu0 %vm295_vm2, %v616_v25 }
 0x2ff   :  { %v271_v26 = vpop.trf.xlu1 }
 0x300   :  { %1026 = vmatprep.mubr.msk.f32.mxu1 %vm295_vm2, %v271_v26 }
 0x303   :  { %v272_v27 = vpop.trf.xlu1 }
 0x304   :  { %1027 = vmatmul.mubr.msk.f32.vlgmr.msra.gmra.mrb[0].mxu1 %vm295_vm2, %v272_v27 }
 0x307   :  { %v273_v28 = vpop.trf.xlu1 }
 0x308   :  { %1029 = vmatprep.mubr.msk.f32.mxu1 %vm295_vm2, %v273_v28 }
 0x30b   :  { %v274_v29 = vpop.trf.xlu1 }
 0x30c   :  { %1030 = vmatmul.mubr.msk.f32.gmra.mrb[2].mxu1 %vm295_vm2, %v274_v29 }
 0x3c8   :  { %v1048_v30 = vpop.f32.mrb[4].mxu0 }
 0x3c9   :  { %v715_v31 = vpop.f32.mrb[5].mxu0  ;;  %v721_v48 = vadd.f32 %v1048_v30, %v248_v34 }
 0x3ca   :  { %v716_v50 = vadd.f32 %v715_v31, %v247_v35 }
 0x3cb   :  { %v737_v54 = vsel %vm65_vm0, %v721_v48, -inf }
 0x3cc   :  { %v734_v55 = vsel %vm65_vm0, %v716_v50, -inf }
 0x3d0   :  { %v1051_v32 = vpop.f32.mrb[6].mxu0 }
 0x3d1   :  { %v725_v33 = vpop.f32.mrb[7].mxu0  ;;  %v731_v52 = vadd.f32 %v1051_v32, %v250_v42 }
 0x3d2   :  { %v726_v53 = vadd.f32 %v725_v33, %v249_v43 }
 0x3d3   :  { %v743_v56 = vsel %vm65_vm0, %v731_v52, -inf }
 0x3d4   :  { %v740_v57 = vsel %vm65_vm0, %v726_v53, -inf }
 0x3d7   :  { %v1028_v36 = vpop.f32.mrb[0].mxu1 }
 0x3d8   :  { %v380_v37 = vadd.f32 %v1028_v36, %v248_v34  ;;  %v374_v38 = vpop.f32.mrb[1].mxu1 }
 0x3d9   :  { %v375_v39 = vadd.f32 %v374_v38, %v247_v35 }
 0x3da   :  { %v396_v40 = vsel %vm65_vm0, %v380_v37, -inf }
 0x3db   :  { %397 = vmax.xlane.f32.xlu1 %v396_v40  ;;  %v393_v41 = vsel %vm65_vm0, %v375_v39, -inf }
 0x3dc   :  { %394 = vmax.xlane.f32.xlu0 %v393_v41 }
 0x3df   :  { %v1031_v44 = vpop.f32.mrb[2].mxu1 }
 0x3e0   :  { %v390_v45 = vadd.f32 %v1031_v44, %v250_v42  ;;  %v384_v46 = vpop.f32.mrb[3].mxu1 }
 0x3e1   :  { %v385_v47 = vadd.f32 %v384_v46, %v249_v43 }
 0x3e2   :  { %v402_v49 = vsel %vm65_vm0, %v390_v45, -inf }
 0x3e3   :  { %403 = vmax.xlane.f32.xlu1 %v402_v49  ;;  %v399_v51 = vsel %vm65_vm0, %v385_v47, -inf }
 0x3e4   :  { %400 = vmax.xlane.f32.xlu0 %v399_v51 }
 0x3e7   :  { %738 = vmax.xlane.f32.xlu1 %v737_v54 }
 0x3e8   :  { %735 = vmax.xlane.f32.xlu0 %v734_v55 }
 0x3eb   :  { %744 = vmax.xlane.f32.xlu1 %v743_v56 }
 0x3ec   :  { %741 = vmax.xlane.f32.xlu0 %v740_v57 }
 0x468   :  { %v398_v58 = vpop.xlane.xlu1 %397 }
 0x469   :  { %v406_v59 = vsub.f32 %v380_v37, %v398_v58  ;;  %v395_v60 = vpop.xlane.xlu0 %394 }
 0x46a   :  { %v405_v61 = vsub.f32 %v375_v39, %v395_v60 }
 0x46b   :  { %v411_v62 = vmul.f32 1.442695, %v406_v59 }
 0x46c   :  { %v409_v63 = vmul.f32 1.442695, %v405_v61 }
 0x46d   :  { %1126 = vpow2.f32 %v411_v62 }
 0x46e   :  { %1128 = vpow2.f32 %v409_v63 }
 0x470   :  { %v404_v0 = vpop.xlane.xlu1 %403 }
 0x471   :  { %v408_v1 = vsub.f32 %v390_v45, %v404_v0  ;;  %v401_v2 = vpop.xlane.xlu0 %400 }
 0x472   :  { %v407_v3 = vsub.f32 %v385_v47, %v401_v2 }
 0x473   :  { %v415_v4 = vmul.f32 1.442695, %v408_v1 }
 0x474   :  { %v413_v5 = vmul.f32 1.442695, %v407_v3  ;;  %v739_v7 = vpop.xlane.xlu1 %738 }
 0x475   :  { %1130 = vpow2.f32 %v415_v4  ;;  %v747_v8 = vsub.f32 %v721_v48, %v739_v7  ;;  %v736_v10 = vpop.xlane.xlu0 %735 }
 0x476   :  { %1132 = vpow2.f32 %v413_v5  ;;  %v746_v11 = vsub.f32 %v716_v50, %v736_v10 }
 0x477   :  { %v1389_v12 = vpop.eup %1126  ;;  %v752_v13 = vmul.f32 1.442695, %v747_v8 }
 0x478   :  { %v1129_v14 = vpop.eup %1128  ;;  %v750_v15 = vmul.f32 1.442695, %v746_v11  ;;  %v745_v16 = vpop.xlane.xlu1 %744  ;;  %v420_v17 = vsel %vm65_vm0, %v1389_v12, 0.0 }
 0x479   :  { %1134 = vpow2.f32 %v752_v13  ;;  %v749_v18 = vsub.f32 %v731_v52, %v745_v16  ;;  %421 = vadd.xlane.f32.xlu1 %v420_v17  ;;  %v742_v19 = vpop.xlane.xlu0 %741  ;;  %v417_v20 = vsel %vm65_vm0, %v1129_v14, 0.0 }
 0x47a   :  { %1136 = vpow2.f32 %v750_v15  ;;  %v748_v21 = vsub.f32 %v726_v53, %v742_v19  ;;  %418 = vadd.xlane.f32.xlu0 %v417_v20 }
 0x47b   :  { %v756_v22 = vmul.f32 1.442695, %v749_v18 }
 0x47c   :  { %v754_v23 = vmul.f32 1.442695, %v748_v21 }
 0x47d   :  { %1138 = vpow2.f32 %v756_v22 }
 0x47e   :  { %1140 = vpow2.f32 %v754_v23 }
 0x47f   :  { %v1131_v24 = vpop.eup %1130 }
 0x480   :  { %v1133_v25 = vpop.eup %1132  ;;  %v426_v26 = vsel %vm65_vm0, %v1131_v24, 0.0 }
 0x481   :  { %427 = vadd.xlane.f32.xlu1 %v426_v26  ;;  %v423_v27 = vsel %vm65_vm0, %v1133_v25, 0.0 }
 0x482   :  { %424 = vadd.xlane.f32.xlu0 %v423_v27 }
 0x483   :  { %v1135_v28 = vpop.eup %1134 }
 0x484   :  { %v1137_v29 = vpop.eup %1136  ;;  %v761_v30 = vsel %vm65_vm0, %v1135_v28, 0.0 }
 0x485   :  { %762 = vadd.xlane.f32.xlu1 %v761_v30  ;;  %v758_v31 = vsel %vm65_vm0, %v1137_v29, 0.0 }
 0x486   :  { %759 = vadd.xlane.f32.xlu0 %v758_v31 }
 0x487   :  { %v1139_v32 = vpop.eup %1138 }
 0x488   :  { %v1141_v33 = vpop.eup %1140  ;;  %v767_v34 = vsel %vm65_vm0, %v1139_v32, 0.0 }
 0x489   :  { %768 = vadd.xlane.f32.xlu1 %v767_v34  ;;  %v764_v35 = vsel %vm65_vm0, %v1141_v33, 0.0 }
 0x48a   :  { %765 = vadd.xlane.f32.xlu0 %v764_v35 }
 0x49a   :  { %1114 = vrot.lane.b32.xlu1 %v1370_v9, %s1266_s2 }
 0x4a0   :  { %1109 = vrot.lane.b32.xlu0 %v1367_v6, %s1266_s2 }
 0x506   :  { %v422_v37 = vpop.xlane.xlu1 %421 }
 0x507   :  { %v419_v36 = vpop.xlane.xlu0 %418 }
 0x508   :  { %1142 = vrcp.f32 %v419_v36 }
 0x509   :  { %1144 = vrcp.f32 %v422_v37 }
 0x50e   :  { %v428_v38 = vpop.xlane.xlu1 %427 }
 0x50f   :  { %v425_v39 = vpop.xlane.xlu0 %424 }
 0x510   :  { %1146 = vrcp.f32 %v425_v39 }
 0x511   :  { %1148 = vrcp.f32 %v428_v38 }
 0x512   :  { %v1143_v40 = vpop.eup %1142  ;;  %v763_v41 = vpop.xlane.xlu1 %762 }
 0x513   :  { %v760_v42 = vpop.xlane.xlu0 %759  ;;  %v433_v43 = vmul.f32 %v1143_v40, %v1129_v14  ;;  %v1145_v53 = vpop.eup %1144 }
 0x514   :  { %1150 = vrcp.f32 %v760_v42  ;;  %v434_v55 = vmul.f32 %v1145_v53, %v1389_v12 }
 0x515   :  { %1036 = vmatprep.mubr.msk.f32.mxu1 %vm65_vm0, %v433_v43  ;;  %1152 = vrcp.f32 %v763_v41 }
 0x516   :  { %v769_v44 = vpop.xlane.xlu1 %768 }
 0x517   :  { %v766_v45 = vpop.xlane.xlu0 %765 }
 0x518   :  { %1154 = vrcp.f32 %v766_v45 }
 0x519   :  { %1156 = vrcp.f32 %v769_v44 }
 0x51a   :  { %v1115_v46 = vpop.permute.xlu1 %1114  ;;  %v1147_v54 = vpop.eup %1146 }
 0x51b   :  { %v1110_v47 = vpop.permute.xlu0 %1109  ;;  %v1117_v9 = vunpack.i.h.bf16 %v1115_v46  ;;  %v1116_v48 = vunpack.i.l.bf16 %v1115_v46  ;;  %v1149_v56 = vpop.eup %1148  ;;  %v435_v57 = vmul.f32 %v1147_v54, %v1133_v25 }
 0x51c   :  { %v1112_v6 = vunpack.i.h.bf16 %v1110_v47  ;;  %v1111_v49 = vunpack.i.l.bf16 %v1110_v47  ;;  %v436_v59 = vmul.f32 %v1149_v56, %v1131_v24 }
 0x51d   :  { %v1084_v52 = vpack.c.bf16 %v1117_v9, %v1116_v48 }
 0x51e   :  { %v1074_v51 = vpack.c.bf16 %v1112_v6, %v1111_v49  ;;  %v1151_v58 = vpop.eup %1150 }
 0x51f   :  { %v1153_v60 = vpop.eup %1152  ;;  %v774_v61 = vmul.f32 %v1151_v58, %v1137_v29 }
 0x520   :  { %1076 = vmatprep.subr.msk.bf16.mxu1 %vm1405_vm3, %v1074_v51  ;;  %v775_v63 = vmul.f32 %v1153_v60, %v1135_v28 }
 0x521   :  { %1079 = vmatpush3.bf16.xpose.msk.msra.mxu1 %vm1405_vm3, %v1074_v51 }
 0x522   :  { %1086 = vmatprep.subr.msk.bf16.mxu1 %vm1405_vm3, %v1084_v52  ;;  %v1155_v62 = vpop.eup %1154 }
 0x523   :  { %v1157_v0 = vpop.eup %1156  ;;  %v776_v1 = vmul.f32 %v1155_v62, %v1141_v33 }
 0x524   :  { %v777_v2 = vmul.f32 %v1157_v0, %v1139_v32 }
 0x528   :  { %1037 = vmatmul.mubr.msk.f32.vlgmr.msra.gmra.mrb[4].mxu1 %vm65_vm0, %v434_v55 }
 0x529   :  { %1039 = vmatprep.mubr.msk.f32.mxu1 %vm65_vm0, %v435_v57  ;;  %1089 = vmatpush3.bf16.xpose.msk.msra.mxu1 %vm1405_vm3, %v1084_v52 }
 0x52c   :  { %1040 = vmatmul.mubr.msk.f32.gmra.mrb[6].mxu1 %vm65_vm0, %v436_v59 }
 0x52d   :  { %1056 = vmatprep.mubr.msk.f32.mxu1 %vm65_vm0, %v774_v61 }
 0x530   :  { %1057 = vmatmul.mubr.msk.f32.vlgmr.msra.gmra.mrb[8].mxu1 %vm65_vm0, %v775_v63 }
 0x531   :  { %1059 = vmatprep.mubr.msk.f32.mxu1 %vm65_vm0, %v776_v1 }
 0x534   :  { %1060 = vmatmul.mubr.msk.f32.gmra.mrb[10].mxu1 %vm65_vm0, %v777_v2 }
 0x5fb   :  { %v1038_v3 = vpop.f32.mrb[4].mxu1 }
 0x5fc   :  { %v523_v4 = vpop.f32.mrb[5].mxu1  ;;  %v545_v5 = vsel %vm295_vm2, %v1038_v3, 0.0 }
 0x5fd   :  { %546 = vadd.xlane.f32.xlu0 %v545_v5  ;;  %v542_v7 = vsel %vm295_vm2, %v523_v4, 0.0 }
 0x5fe   :  { %543 = vadd.xlane.f32.xlu1 %v542_v7 }
 0x5ff   :  { %v1041_v8 = vpop.f32.mrb[6].mxu1 }
 0x600   :  { %v533_v10 = vpop.f32.mrb[7].mxu1  ;;  %v551_v11 = vsel %vm295_vm2, %v1041_v8, 0.0 }
 0x601   :  { %v548_v12 = vsel %vm295_vm2, %v533_v10, 0.0 }
 0x602   :  { %552 = vadd.xlane.f32.xlu1 %v551_v11  ;;  %549 = vadd.xlane.f32.xlu0 %v548_v12 }
 0x603   :  { %v1058_v13 = vpop.f32.mrb[8].mxu1 }
 0x604   :  { %v864_v14 = vpop.f32.mrb[9].mxu1  ;;  %v886_v15 = vsel %vm295_vm2, %v1058_v13, 0.0 }
 0x605   :  { %v883_v16 = vsel %vm295_vm2, %v864_v14, 0.0 }
 0x606   :  { %887 = vadd.xlane.f32.xlu1 %v886_v15  ;;  %884 = vadd.xlane.f32.xlu0 %v883_v16 }
 0x607   :  { %v1061_v17 = vpop.f32.mrb[10].mxu1 }
 0x608   :  { %v874_v18 = vpop.f32.mrb[11].mxu1  ;;  %v892_v19 = vsel %vm295_vm2, %v1061_v17, 0.0 }
 0x609   :  { %v889_v20 = vsel %vm295_vm2, %v874_v18, 0.0 }
 0x60a   :  { %893 = vadd.xlane.f32.xlu1 %v892_v19  ;;  %890 = vadd.xlane.f32.xlu0 %v889_v20 }
 0x68a   :  { %v547_v21 = vpop.xlane.xlu0 %546 }
 0x68b   :  { %v955_v22 = vmul.f32 -0.0625, %v547_v21  ;;  %v544_v23 = vpop.xlane.xlu1 %543 }
 0x68c   :  { %v954_v24 = vmul.f32 -0.0625, %v544_v23 }
 0x68d   :  { %v565_v25 = vmul.f32 1.442695, %v955_v22 }
 0x68e   :  { %v563_v26 = vmul.f32 1.442695, %v954_v24 }
 0x68f   :  { %1158 = vpow2.f32 %v565_v25  ;;  %v553_v27 = vpop.xlane.xlu1 %552  ;;  %v550_v28 = vpop.xlane.xlu0 %549 }
 0x690   :  { %1160 = vpow2.f32 %v563_v26  ;;  %v957_v29 = vmul.f32 -0.0625, %v553_v27  ;;  %v956_v30 = vmul.f32 -0.0625, %v550_v28 }
 0x692   :  { %v569_v31 = vmul.f32 1.442695, %v957_v29  ;;  %v567_v32 = vmul.f32 1.442695, %v956_v30 }
 0x693   :  { %v888_v33 = vpop.xlane.xlu1 %887  ;;  %v885_v34 = vpop.xlane.xlu0 %884 }
 0x694   :  { %1162 = vpow2.f32 %v569_v31  ;;  %v969_v35 = vmul.f32 -0.0625, %v888_v33  ;;  %v968_v36 = vmul.f32 -0.0625, %v885_v34 }
 0x695   :  { %1164 = vpow2.f32 %v567_v32 }
 0x696   :  { %v905_v37 = vmul.f32 1.442695, %v969_v35  ;;  %v903_v38 = vmul.f32 1.442695, %v968_v36 }
 0x697   :  { %v894_v39 = vpop.xlane.xlu1 %893  ;;  %v891_v40 = vpop.xlane.xlu0 %890 }
 0x698   :  { %1166 = vpow2.f32 %v905_v37  ;;  %v971_v41 = vmul.f32 -0.0625, %v894_v39  ;;  %v970_v42 = vmul.f32 -0.0625, %v891_v40 }
 0x699   :  { %v1159_v43 = vpop.eup %1158  ;;  %1168 = vpow2.f32 %v903_v38 }
 0x69a   :  { %v1161_v44 = vpop.eup %1160  ;;  %v572_v45 = vadd.f32 1.0, %v1159_v43  ;;  %v909_v46 = vmul.f32 1.442695, %v971_v41  ;;  %v907_v9 = vmul.f32 1.442695, %v970_v42 }
 0x69b   :  { %v571_v47 = vadd.f32 1.0, %v1161_v44 }
 0x69c   :  { %1170 = vrcp.f32 %v572_v45 }
 0x69d   :  { %1172 = vrcp.f32 %v571_v47 }
 0x69e   :  { %v1163_v48 = vpop.eup %1162  ;;  %1174 = vpow2.f32 %v909_v46 }
 0x69f   :  { %v1165_v6 = vpop.eup %1164  ;;  %v574_v49 = vadd.f32 1.0, %v1163_v48  ;;  %1176 = vpow2.f32 %v907_v9 }
 0x6a0   :  { %v573_v50 = vadd.f32 1.0, %v1165_v6 }
 0x6a1   :  { %1178 = vrcp.f32 %v574_v49 }
 0x6a2   :  { %v1167_v51 = vpop.eup %1166  ;;  %1180 = vrcp.f32 %v573_v50 }
 0x6a3   :  { %v1169_v52 = vpop.eup %1168  ;;  %v912_v53 = vadd.f32 1.0, %v1167_v51 }
 0x6a4   :  { %v911_v54 = vadd.f32 1.0, %v1169_v52 }
 0x6a5   :  { %1182 = vrcp.f32 %v912_v53 }
 0x6a6   :  { %v1171_v55 = vpop.eup %1170  ;;  %1184 = vrcp.f32 %v911_v54 }
 0x6a7   :  { %v1173_v56 = vpop.eup %1172  ;;  %v584_v57 = vadd.f32 1.0, %v1171_v55 }
 0x6a8   :  { %v1175_v58 = vpop.eup %1174  ;;  %v583_v59 = vadd.f32 1.0, %v1173_v56 }
 0x6a9   :  { %v1177_v60 = vpop.eup %1176  ;;  %589 = vst.msk [vmem:[%s1470_s5 + $0x8] sm:$0xff] %vm587_vm4, %v584_v57  ;;  %v914_v61 = vadd.f32 1.0, %v1175_v58 }
 0x6aa   :  { %588 = vst.msk [vmem:[%s1470_s5] sm:$0xff] %vm587_vm4, %v583_v59  ;;  %v913_v62 = vadd.f32 1.0, %v1177_v60 }
 0x6ab   :  { %v1179_v63 = vpop.eup %1178  ;;  %1186 = vrcp.f32 %v914_v61 }
 0x6ac   :  { %v1181_v0 = vpop.eup %1180  ;;  %v586_v1 = vadd.f32 1.0, %v1179_v63  ;;  %1188 = vrcp.f32 %v913_v62 }
 0x6ad   :  { %v585_v2 = vadd.f32 1.0, %v1181_v0 }
 0x6ae   :  { %591 = vst.msk [vmem:[%s1470_s5 + $0x18] sm:$0xff] %vm587_vm4, %v586_v1 }
 0x6af   :  { %v1183_v3 = vpop.eup %1182  ;;  %590 = vst.msk [vmem:[%s1470_s5 + $0x10] sm:$0xff] %vm587_vm4, %v585_v2 }
 0x6b0   :  { %v1185_v4 = vpop.eup %1184  ;;  %v924_v5 = vadd.f32 1.0, %v1183_v3 }
 0x6b1   :  { %v923_v7 = vadd.f32 1.0, %v1185_v4 }
 0x6b2   :  { %973 = vst.msk [vmem:[%s1470_s5 + $0x28] sm:$0xff] %vm587_vm4, %v924_v5 }
 0x6b3   :  { %972 = vst.msk [vmem:[%s1470_s5 + $0x20] sm:$0xff] %vm587_vm4, %v923_v7 }
 0x6b5   :  { %v1187_v8 = vpop.eup %1186 }
 0x6b6   :  { %v1189_v10 = vpop.eup %1188  ;;  %v926_v11 = vadd.f32 1.0, %v1187_v8 }
 0x6b7   :  { %v925_v12 = vadd.f32 1.0, %v1189_v10 }
 0x6b8   :  { %975 = vst.msk [vmem:[%s1470_s5 + $0x38] sm:$0xff] %vm587_vm4, %v926_v11 }
 0x6b9   :  { %974 = vst.msk [vmem:[%s1470_s5 + $0x30] sm:$0xff] %vm587_vm4, %v925_v12 }
 0x6ba   :  { %936 = vsyncpa [#allocation4], 1 }
 0x6bb   :  { %937 = vsyncpa [#allocation6], 1 }

</bundles_post_ra>
